<compile_context>
chip_gen: v6e
topology: v6e:2x2x1
jax: 0.10.0
libtpu: 0.0.40
codegen_flags: <defaults>
</compile_context>

<pallas_src>
import jax
import jax.numpy as jnp
from jax.experimental import pallas as pl
from jax.experimental.pallas import tpu as pltpu


def fcnet_kernel(x_ref, w1_ref, b1_ref, w2_ref, b2_ref, out_ref):
    # x_ref: (TB, In_p) bf16 ; w1_ref: (In_p, H_p) bf16 ; b1_ref: (1, H_p) f32
    # w2_ref: (H_p, O_p) bf16 ; b2_ref: (1, O_p) f32 ; out_ref: (TB, O_p) f32
    x = x_ref[...]
    h = jnp.dot(x, w1_ref[...], preferred_element_type=jnp.float32)   # MXU, f32 acc
    h = h + b1_ref[...]                                               # (TB,H)+(1,H)
    h = jnp.maximum(h, 0.0)                                           # ReLU (VPU)
    # dropout(p=0.5) in eval mode == identity
    o = jnp.dot(h.astype(w2_ref.dtype), w2_ref[...],
                preferred_element_type=jnp.float32)                   # MXU, f32 acc
    o = o + b2_ref[...]                                               # (TB,O)+(1,O)
    out_ref[...] = o.astype(out_ref.dtype)


def _round_up(x, m):
    return (x + m - 1) // m * m


def fcnet_forward(x, w1, b1, w2, b2, *, block_b=256):
    """x: (B, In); w1: (In, H); b1: (H,); w2: (H, O); b2: (O,).

    Weights are stored already-transposed vs. PyTorch nn.Linear, i.e. as
    (in_features, out_features), so the kernel computes plain x @ W + b.
    """
    B, In = x.shape
    H = w1.shape[1]
    O = w2.shape[1]

    # Lane-pad feature dims to 128 (lane-dense MXU passes & stores);
    # sublane-align the batch tile to 8 rows (f32 sublane).
    In_p = _round_up(In, 128)
    H_p = _round_up(H, 128)
    O_p = _round_up(O, 128)
    TB = min(block_b, _round_up(B, 8))
    B_p = _round_up(B, TB)

    # Zero-pad + cast operands. bf16 operands, f32 biases/accumulator.
    xp = jnp.zeros((B_p, In_p), jnp.bfloat16).at[:B, :In].set(x.astype(jnp.bfloat16))
    w1p = jnp.zeros((In_p, H_p), jnp.bfloat16).at[:In, :H].set(w1.astype(jnp.bfloat16))
    b1p = jnp.zeros((1, H_p), jnp.float32).at[0, :H].set(b1.astype(jnp.float32))
    w2p = jnp.zeros((H_p, O_p), jnp.bfloat16).at[:H, :O].set(w2.astype(jnp.bfloat16))
    b2p = jnp.zeros((1, O_p), jnp.float32).at[0, :O].set(b2.astype(jnp.float32))

    grid = (pl.cdiv(B_p, TB),)

    out_p = pl.pallas_call(
        fcnet_kernel,
        out_shape=jax.ShapeDtypeStruct((B_p, O_p), jnp.float32),
        grid_spec=pl.GridSpec(
            grid=grid,
            in_specs=[
                # x: one (TB, In_p) tile per grid step -> pipelined
                pl.BlockSpec((TB, In_p), lambda i: (i, 0)),
                # weights / biases: constant block -> loaded once, VMEM-resident
                pl.BlockSpec((In_p, H_p), lambda i: (0, 0)),
                pl.BlockSpec((1, H_p), lambda i: (0, 0)),
                pl.BlockSpec((H_p, O_p), lambda i: (0, 0)),
                pl.BlockSpec((1, O_p), lambda i: (0, 0)),
            ],
            out_specs=pl.BlockSpec((TB, O_p), lambda i: (i, 0)),
        ),
        compiler_params=pltpu.CompilerParams(
            # batch tiles are independent -> shard across TCs on v7x megacore
            dimension_semantics=("parallel",),
            # NOTE: for large In/H/O raise vmem_limit_bytes and/or add a K-tiling
            # grid axis with a pl.when-guarded f32 accumulator scratch so resident
            # weights fit v7x's 64 MiB VMEM. Default limits are ample at these sizes.
        ),
    )(xp, w1p, b1p, w2p, b2p)

    # Strip the padding and return in the caller's dtype.
    return out_p[:B, :O].astype(x.dtype)


if __name__ == "__main__":
    # Small shapes consistent with FCNet(input_size, hidden_size, output_size)
    batch, input_size, hidden_size, output_size = 8, 32, 64, 16

    key = jax.random.PRNGKey(0)
    kx, kw1, kb1, kw2, kb2 = jax.random.split(key, 5)

    x = jax.random.normal(kx, (batch, input_size), dtype=jnp.float32)

    # Deterministic parameter init (uniform, like PyTorch Linear's default range)
    lim1 = 1.0 / (input_size ** 0.5)
    w1 = jax.random.uniform(kw1, (input_size, hidden_size), jnp.float32, -lim1, lim1)
    b1 = jax.random.uniform(kb1, (hidden_size,), jnp.float32, -lim1, lim1)
    lim2 = 1.0 / (hidden_size ** 0.5)
    w2 = jax.random.uniform(kw2, (hidden_size, output_size), jnp.float32, -lim2, lim2)
    b2 = jax.random.uniform(kb2, (output_size,), jnp.float32, -lim2, lim2)

    out = fcnet_forward(x, w1, b1, w2, b2)
    jax.block_until_ready(out)

    # Reference check in plain JAX (f32). Tolerance loosened for bf16 MXU operands.
    ref = jnp.maximum(x @ w1 + b1, 0.0) @ w2 + b2
    assert out.shape == (batch, output_size)
    assert jnp.allclose(out, ref, atol=2e-2, rtol=2e-2), (
        float(jnp.max(jnp.abs(out - ref))))

    print("KERNEL_OK")
</pallas_src>

<mosaic_0001>
module attributes {stable_mosaic.version = 11 : i64} {
  func.func @fcnet_kernel(%arg0: i32, %arg1: memref<8x128xbf16, #tpu.memory_space<vmem>>, %arg2: memref<128x128xbf16, #tpu.memory_space<vmem>>, %arg3: memref<1x128xf32, #tpu.memory_space<vmem>>, %arg4: memref<128x128xbf16, #tpu.memory_space<vmem>>, %arg5: memref<1x128xf32, #tpu.memory_space<vmem>>, %arg6: memref<8x128xf32, #tpu.memory_space<vmem>>) attributes {dimension_semantics = [#tpu.dimension_semantics<parallel>], iteration_bounds = array<i64: 1>, scalar_prefetch = 0 : i64, scratch_operands = 0 : i64, tpu.core_type = #tpu.core_type<tc>, window_params = [{transform_indices = @transform_0, window_bounds = array<i64: 8, 128>}, {pipeline_mode = #tpu.pipeline_mode<synchronous>, transform_indices = @transform_1, window_bounds = array<i64: 128, 128>}, {pipeline_mode = #tpu.pipeline_mode<synchronous>, transform_indices = @transform_2, window_bounds = array<i64: 1, 128>}, {pipeline_mode = #tpu.pipeline_mode<synchronous>, transform_indices = @transform_3, window_bounds = array<i64: 128, 128>}, {pipeline_mode = #tpu.pipeline_mode<synchronous>, transform_indices = @transform_4, window_bounds = array<i64: 1, 128>}, {transform_indices = @transform_5, window_bounds = array<i64: 8, 128>}]} {
    %c0 = arith.constant 0 : index
    %c0_0 = arith.constant 0 : index
    %0 = vector.load %arg1[%c0, %c0_0] : memref<8x128xbf16, #tpu.memory_space<vmem>>, vector<8x128xbf16>
    %c0_1 = arith.constant 0 : index
    %c0_2 = arith.constant 0 : index
    %1 = vector.load %arg2[%c0_1, %c0_2] : memref<128x128xbf16, #tpu.memory_space<vmem>>, vector<128x128xbf16>
    %cst = arith.constant dense<0.000000e+00> : vector<8x128xf32>
    %2 = tpu.matmul %0, %1, %cst {dimension_numbers = #tpu.dot_dimension_numbers<[1], [0], [0], [1], [0, 0, 1, 1], [], []>} : vector<8x128xbf16>, vector<128x128xbf16>, vector<8x128xf32> -> vector<8x128xf32>
    %c0_3 = arith.constant 0 : index
    %c0_4 = arith.constant 0 : index
    %3 = vector.load %arg3[%c0_3, %c0_4] : memref<1x128xf32, #tpu.memory_space<vmem>>, vector<1x128xf32>
    %4 = vector.broadcast %3 : vector<1x128xf32> to vector<8x128xf32>
    %5 = arith.addf %2, %4 : vector<8x128xf32>
    %cst_5 = arith.constant 0.000000e+00 : f32
    %6 = vector.broadcast %cst_5 : f32 to vector<8x128xf32>
    %7 = arith.maximumf %5, %6 : vector<8x128xf32>
    %8 = arith.truncf %7 : vector<8x128xf32> to vector<8x128xbf16>
    %c0_6 = arith.constant 0 : index
    %c0_7 = arith.constant 0 : index
    %9 = vector.load %arg4[%c0_6, %c0_7] : memref<128x128xbf16, #tpu.memory_space<vmem>>, vector<128x128xbf16>
    %cst_8 = arith.constant dense<0.000000e+00> : vector<8x128xf32>
    %10 = tpu.matmul %8, %9, %cst_8 {dimension_numbers = #tpu.dot_dimension_numbers<[1], [0], [0], [1], [0, 0, 1, 1], [], []>} : vector<8x128xbf16>, vector<128x128xbf16>, vector<8x128xf32> -> vector<8x128xf32>
    %c0_9 = arith.constant 0 : index
    %c0_10 = arith.constant 0 : index
    %11 = vector.load %arg5[%c0_9, %c0_10] : memref<1x128xf32, #tpu.memory_space<vmem>>, vector<1x128xf32>
    %12 = vector.broadcast %11 : vector<1x128xf32> to vector<8x128xf32>
    %13 = arith.addf %10, %12 : vector<8x128xf32>
    %c0_11 = arith.constant 0 : index
    %c0_12 = arith.constant 0 : index
    %14 = vector.load %arg6[%c0_11, %c0_12] : memref<8x128xf32, #tpu.memory_space<vmem>>, vector<8x128xf32>
    tpu.vector_store %arg6[%c0_11, %c0_12], %13 {strides = array<i32>} : memref<8x128xf32, #tpu.memory_space<vmem>>, vector<8x128xf32>,
    return
  }
  func.func @transform_0(%arg0: i32) -> (i32, i32) {
    %c0_i32 = arith.constant 0 : i32
    %c0_i32_0 = arith.constant 0 : i32
    return %arg0, %c0_i32 : i32, i32
  }
  func.func @transform_1(%arg0: i32) -> (i32, i32) {
    %c0_i32 = arith.constant 0 : i32
    %c0_i32_0 = arith.constant 0 : i32
    %c0_i32_1 = arith.constant 0 : i32
    return %c0_i32, %c0_i32_0 : i32, i32
  }
  func.func @transform_2(%arg0: i32) -> (i32, i32) {
    %c0_i32 = arith.constant 0 : i32
    %c0_i32_0 = arith.constant 0 : i32
    %c0_i32_1 = arith.constant 0 : i32
    return %c0_i32, %c0_i32_0 : i32, i32
  }
  func.func @transform_3(%arg0: i32) -> (i32, i32) {
    %c0_i32 = arith.constant 0 : i32
    %c0_i32_0 = arith.constant 0 : i32
    %c0_i32_1 = arith.constant 0 : i32
    return %c0_i32, %c0_i32_0 : i32, i32
  }
  func.func @transform_4(%arg0: i32) -> (i32, i32) {
    %c0_i32 = arith.constant 0 : i32
    %c0_i32_0 = arith.constant 0 : i32
    %c0_i32_1 = arith.constant 0 : i32
    return %c0_i32, %c0_i32_0 : i32, i32
  }
  func.func @transform_5(%arg0: i32) -> (i32, i32) {
    %c0_i32 = arith.constant 0 : i32
    %c0_i32_0 = arith.constant 0 : i32
    return %arg0, %c0_i32 : i32, i32
  }
}

</mosaic_0001>

<bundles_post_ra>
// kernel: tpu_custom_call.1
= control target key start
LH: loop header
LB: loop body
LE: loop exit
PB: predicated region body
PF: predicated region fallthrough
CT: control target
= control target key end

     0   :  { %10 = vsyncpa [#allocation3], 0  ;;  %s545_s0 = inlined_call_operand.hbm [shape: bf16[8,128], index: 0, kind: input, shape index: {}]   ;;  %s546_s1 = inlined_call_operand.hbm [shape: bf16[128,128], index: 1, kind: input, shape index: {}]   ;;  %s547_s2 = inlined_call_operand.vmem [shape: f32[1,128], index: 2, kind: input, shape index: {}]   ;;  %s548_s3 = inlined_call_operand.hbm [shape: bf16[128,128], index: 3, kind: input, shape index: {}]   ;;  %s549_s4 = inlined_call_operand.vmem [shape: f32[1,128], index: 4, kind: input, shape index: {}]   ;;  %s550_s5 = inlined_call_operand.hbm [shape: f32[8,128], index: 5, kind: output, shape index: {}]  }
   0x1   :  { %11 = vsyncpa [#allocation6], 0 }
   0x2   :  { %12 = vsyncpa [#allocation4], 0  ;;  %s489_s18 = smov [#allocation5]  }
   0x3   :  { %s28_s19 = sshll.u32 %s489_s18, 4  ;;  %s29_s19 = int_to_ptr.vmem [resolvable:$true] %s28_s19 }
   0x4   :  { %s411_s20 = scalar_lea.vmem %s29_s19, 1024  ;;  %p416_p1 = scmp.lt.s32.totalorder %s29_s19, %s29_s19 }
   0x5   :  { %p412_p0 = scmp.ne.s32.totalorder %s29_s19, %s411_s20  ;;  %p417_p2 = scmp.lt.s32.totalorder %s411_s20, %s411_s20 }
   0x7   :  { %p418_p3 = por %p417_p2, %p416_p1 }
   0x9   :  { %p419_p4 = pnand %p418_p3, %p412_p0 }
   0xb   :  { %422 = shalt.err (!%p419_p4)
}
   0xc   :  { %s490_s21 = smov 64   ;;  %s491_s22 = smov 4  }
   0xd   :  { %34 = dma.hbm_to_vmem [thread:$0]  %s546_s1, 1024, %s29_s19, [#allocation6], %s490_s21, %s490_s21, %s491_s22  }
   0xe   :  { %s492_s25 = smov [#allocation2]   ;;  %s493_s27 = smov [#allocation7]  }
   0xf   :  { %s19_s26 = sshll.u32 %s492_s25, 4  ;;  %s42_s28 = sshll.u32 %s493_s27, 4  ;;  %s20_s26 = int_to_ptr.vmem [resolvable:$true] %s19_s26  ;;  %s43_s28 = int_to_ptr.vmem [resolvable:$true] %s42_s28 }
  0x10   :  { %s431_s29 = scalar_lea.vmem %s20_s26, 64  ;;  %p436_p6 = scmp.lt.s32.totalorder %s20_s26, %s20_s26 }
  0x11   :  { %p432_p5 = scmp.ne.s32.totalorder %s20_s26, %s431_s29  ;;  %p437_p7 = scmp.lt.s32.totalorder %s431_s29, %s431_s29 }
  0x13   :  { %p438_p8 = por %p437_p7, %p436_p6 }
  0x15   :  { %p439_p9 = pnand %p438_p8, %p432_p5 }
  0x17   :  { %442 = shalt.err (!%p439_p9)
}
  0x18   :  { %22 = dma.hbm_to_vmem [thread:$0]  %s545_s0, 64, %s20_s26, [#allocation3]  }
  0x19   :  { %s451_s7 = scalar_lea.vmem %s43_s28, 1024  ;;  %p456_p11 = scmp.lt.s32.totalorder %s43_s28, %s43_s28 }
  0x1a   :  { %p452_p10 = scmp.ne.s32.totalorder %s43_s28, %s451_s7  ;;  %p457_p12 = scmp.lt.s32.totalorder %s451_s7, %s451_s7 }
  0x1c   :  { %p458_p13 = por %p457_p12, %p456_p11 }
  0x1e   :  { %p459_p0 = pnand %p458_p13, %p452_p10 }
  0x20   :  { %462 = shalt.err (!%p459_p0)
}
  0x21   :  { %48 = dma.hbm_to_vmem [thread:$0]  %s548_s3, 1024, %s43_s28, [#allocation6], %s490_s21, %s490_s21, %s491_s22  }
  0x22   :  { %483 = dma.done.wait [#allocation3], 64  }
  0x23   :  { %484 = vsyncadd [#allocation3], 4294967232 }
  0x24   :  { %485 = dma.done.wait [#allocation6], 2048  }
  0x25   :  { %486 = vsyncadd [#allocation6], 4294965248  ;;  %v494_v0 = vmov 0.0   ;;  %vm495_vm0 = vmmov 0   ;;  %v387_v1 = vld [vmem:[#allocation5 + $0x38] sm:$0xff]   ;;  %v388_v2 = vld [vmem:[#allocation5 + $0x30] sm:$0xff]  }
  0x26   :  { %339 = vmatprep.subr.bf16.mxu0 %v494_v0  ;;  %355 = vmatprep.mubr.msk.bf16.mxu0 %vm495_vm0, %v494_v0  ;;  %v389_v3 = vld [vmem:[#allocation5 + $0x28] sm:$0xff]   ;;  %v395_v4 = vld [vmem:[#allocation7 + $0x38] sm:$0xff]   ;;  %v390_v5 = vld [vmem:[#allocation5 + $0x20] sm:$0xff]   ;;  %s496_s11 = smov [#allocation8]  }
  0x27   :  { %359 = vmatprep.subr.bf16.mxu1 %v494_v0  ;;  %375 = vmatprep.mubr.msk.bf16.mxu1 %vm495_vm0, %v494_v0  ;;  %v396_v6 = vld [vmem:[#allocation7 + $0x30] sm:$0xff]   ;;  %v391_v7 = vld [vmem:[#allocation5 + $0x18] sm:$0xff]   ;;  %v397_v8 = vld [vmem:[#allocation7 + $0x28] sm:$0xff]   ;;  %s293_s12 = sshll.u32 %s496_s11, 4  ;;  %s294_s12 = int_to_ptr.vmem [resolvable:$true] %s293_s12 }
  0x28   :  { %340 = vmatpush3.bf16.msra.mxu0 %v387_v1  ;;  %360 = vmatpush3.bf16.msra.mxu1 %v395_v4  ;;  %v392_v9 = vld [vmem:[#allocation5 + $0x10] sm:$0xff]   ;;  %v398_v10 = vld [vmem:[#allocation7 + $0x20] sm:$0xff]   ;;  %v393_v11 = vld [vmem:[#allocation5 + $0x8] sm:$0xff]   ;;  %p468_p2 = scmp.lt.s32.totalorder %s294_s12, %s294_s12 }
  0x29   :  { %341 = vmatprep.subr.bf16.mxu0 %v494_v0  ;;  %361 = vmatprep.subr.bf16.mxu1 %v494_v0  ;;  %v399_v12 = vld [vmem:[#allocation7 + $0x18] sm:$0xff]   ;;  %v394_v13 = vld [vmem:[#allocation5] sm:$0xff]   ;;  %v400_v14 = vld [vmem:[#allocation7 + $0x10] sm:$0xff]  }
  0x2a   :  { %v61_v15 = vld [vmem:[#allocation2] sm:$0xf]  ;;  %v401_v16 = vld [vmem:[#allocation7 + $0x8] sm:$0xff]   ;;  %v402_v17 = vld [vmem:[#allocation7] sm:$0xff]  }
  0x2b   :  { %v303_v18 = vld [vmem:[%s547_s2] ss:$0 sm:$0xff]  ;;  %s463_s2 = scalar_lea.vmem %s294_s12, 128 }
  0x2c   :  { %342 = vmatpush3.bf16.msra.mxu0 %v388_v2  ;;  %362 = vmatpush3.bf16.msra.mxu1 %v396_v6  ;;  %v312_v26 = vld [vmem:[%s549_s4] ss:$0 sm:$0xff]  ;;  %p464_p1 = scmp.ne.s32.totalorder %s294_s12, %s463_s2  ;;  %p469_p3 = scmp.lt.s32.totalorder %s463_s2, %s463_s2 }
  0x2d   :  { %343 = vmatprep.subr.bf16.mxu0 %v494_v0  ;;  %363 = vmatprep.subr.bf16.mxu1 %v494_v0 }
  0x2e   :  { %p470_p4 = por %p469_p3, %p468_p2 }
  0x30   :  { %344 = vmatpush3.bf16.msra.mxu0 %v389_v3  ;;  %364 = vmatpush3.bf16.msra.mxu1 %v397_v8  ;;  %p471_p5 = pnand %p470_p4, %p464_p1 }
  0x31   :  { %345 = vmatprep.subr.bf16.mxu0 %v494_v0  ;;  %365 = vmatprep.subr.bf16.mxu1 %v494_v0 }
  0x34   :  { %346 = vmatpush3.bf16.msra.mxu0 %v390_v5  ;;  %366 = vmatpush3.bf16.msra.mxu1 %v398_v10 }
  0x35   :  { %347 = vmatprep.subr.bf16.mxu0 %v494_v0  ;;  %367 = vmatprep.subr.bf16.mxu1 %v494_v0 }
  0x38   :  { %348 = vmatpush3.bf16.msra.mxu0 %v391_v7  ;;  %368 = vmatpush3.bf16.msra.mxu1 %v399_v12 }
  0x39   :  { %349 = vmatprep.subr.bf16.mxu0 %v494_v0  ;;  %369 = vmatprep.subr.bf16.mxu1 %v494_v0 }
  0x3c   :  { %350 = vmatpush3.bf16.msra.mxu0 %v392_v9  ;;  %370 = vmatpush3.bf16.msra.mxu1 %v400_v14 }
  0x3d   :  { %351 = vmatprep.subr.bf16.mxu0 %v494_v0  ;;  %371 = vmatprep.subr.bf16.mxu1 %v494_v0 }
  0x40   :  { %352 = vmatpush3.bf16.msra.mxu0 %v393_v11  ;;  %372 = vmatpush3.bf16.msra.mxu1 %v401_v16 }
  0x41   :  { %353 = vmatprep.subr.bf16.mxu0 %v494_v0  ;;  %373 = vmatprep.subr.bf16.mxu1 %v494_v0 }
  0x44   :  { %354 = vmatpush3.bf16.msra.mxu0 %v394_v13  ;;  %374 = vmatpush3.bf16.msra.mxu1 %v402_v17 }
  0x47   :  { %356 = vmatmul.mubr.bf16.vlgmr.msra.gmra.mxu0 %v61_v15 }
 0x107   :  { %v167_v19 = vpop.f32.mrf.mxu0 }
 0x108   :  { %v168_v20 = vadd.f32 %v303_v18, %v167_v19 }
 0x109   :  { %v357_v21 = vpop.f32.mrf.mxu0 }
 0x10a   :  { %v173_v22 = vmax.f32 %v168_v20, 0.0 }
 0x10b   :  { %v170_v23 = vpop.f32.mrf.mxu0 }
 0x10c   :  { %v174_v24 = vpack.c.bf16 %v173_v22, %v173_v22 }
 0x10d   :  { %v358_v25 = vpop.f32.mrf.mxu0 }
 0x10e   :  { %376 = vmatmul.mubr.bf16.vlgmr.msra.gmra.mxu1 %v174_v24 }
 0x1ce   :  { %v280_v27 = vpop.f32.mrf.mxu1 }
 0x1cf   :  { %v281_v28 = vadd.f32 %v312_v26, %v280_v27 }
 0x1d0   :  { %v377_v29 = vpop.f32.mrf.mxu1 }
 0x1d1   :  { %286 = vst [vmem:[#allocation8] sm:$0xff] %v281_v28 }
 0x1d2   :  { %v283_v30 = vpop.f32.mrf.mxu1 }
 0x1d3   :  { %474 = shalt.err (!%p471_p5)
}
 0x1d4   :  { %296 = dma.vmem_to_hbm [thread:$0]  %s294_s12, 128, %s550_s5, [#allocation4]   ;;  %v378_v31 = vpop.f32.mrf.mxu1 }
 0x1d5   :  { %487 = dma.done.wait [#allocation4], 128  }
 0x1d6   :  { %488 = vsyncadd [#allocation4], 4294967168 }
 0x1d7   :  { %300 = vsyncpa [#allocation3], 1 }
 0x1d8   :  { %301 = vsyncpa [#allocation6], 1 }
 0x1d9   :  { %302 = vsyncpa [#allocation4], 1 }

</bundles_post_ra>
